<compile_context>
chip_gen: v6e
topology: v6e:2x2x1
jax: 0.10.0
libtpu: 0.0.40
codegen_flags: <defaults>
</compile_context>

<pallas_src>
import jax
import jax.numpy as jnp
from jax.experimental import pallas as pl
from jax.experimental.pallas import tpu as pltpu


def _identity_kernel(x_ref, o_ref):
    # Entire LABlock.forward is `return x`: one full-tile VMEM load + store.
    o_ref[...] = x_ref[...]


def _pick_lane_width(total: int, itemsize: int, max_lane_bytes: int = 128 * 1024):
    """Largest multiple-of-128 divisor of `total`, preferring one that leaves
    rows >= 8 (so row tiling / megacore sharding have work to split), capped
    so a single row stays under `max_lane_bytes`.  Returns None when `total`
    is not a multiple of 128."""
    if total % 128 != 0:
        return None
    cap = max(128, min(total, max_lane_bytes // max(1, itemsize)))
    cap = (cap // 128) * 128
    best_any = None
    lanes = cap
    while lanes >= 128:
        if total % lanes == 0:
            if best_any is None:
                best_any = lanes
            if total // lanes >= 8:
                return lanes          # largest divisor that also keeps rows >= 8
        lanes -= 128
    return best_any


def _pick_row_tile(rows: int, lanes: int, itemsize: int,
                   target_tile_bytes: int = 8 * 1024 * 1024) -> int:
    """Rows per tile: ~target_tile_bytes per block (8 MiB -> per-grid-step
    overhead is a few percent even at v7x's 3.2 TB/s), rounded to a multiple
    of 8, clamped to the row count.  If the whole array would fit in a single
    tile but there are enough rows, shrink so the grid has >=2 steps and both
    v7x TensorCores get a share of the copy."""
    row_bytes = max(1, lanes * itemsize)
    t = max(8, (target_tile_bytes // row_bytes) // 8 * 8)
    t = min(t, rows)
    if rows >= 16:
        while t > 8 and pl.cdiv(rows, t) < 2:
            t = max(8, (t // 2) // 8 * 8)
    # Invariant: t is a multiple of 8, or t == rows (full extent) — both legal.
    return t


def _pallas_identity_copy(x: jax.Array) -> jax.Array:
    """Pallas HBM->VMEM->HBM identity copy (parity/testing path only)."""
    orig_shape = x.shape
    total = x.size
    itemsize = jnp.dtype(x.dtype).itemsize

    lanes = _pick_lane_width(total, itemsize)
    if lanes is None:
        # Element count not a multiple of 128: flatten to the natural 2D shape
        # and still row-tile with cdiv (narrow last dim costs masked stores,
        # but we never stage the whole array as one VMEM block).  Degenerate
        # shapes where all leading dims are 1 fall back to a single small block.
        lanes = orig_shape[-1] if len(orig_shape) >= 1 and orig_shape[-1] > 0 else 1
        rows = total // lanes
    else:
        rows = total // lanes
    x2d = x.reshape(rows, lanes)

    tile_r = _pick_row_tile(rows, lanes, itemsize)
    grid = (pl.cdiv(rows, tile_r),)
    block = (tile_r, lanes)

    out2d = pl.pallas_call(
        _identity_kernel,
        out_shape=jax.ShapeDtypeStruct(x2d.shape, x2d.dtype),
        grid_spec=pltpu.PrefetchScalarGridSpec(
            num_scalar_prefetch=0,
            grid=grid,
            in_specs=[pl.BlockSpec(block, lambda i: (i, 0))],
            out_specs=pl.BlockSpec(block, lambda i: (i, 0)),
        ),
        compiler_params=pltpu.CompilerParams(
            dimension_semantics=("parallel",),
            # 2 input + 2 output pipeline buffers at <=8 MiB each = 32 MiB;
            # 48 MiB leaves headroom and is safe on all chips (v7x physical
            # VMEM is 64 MiB; v5e's default scoped limit of 16 MiB is raised).
            vmem_limit_bytes=48 * 1024 * 1024,
        ),
        # Pure bandwidth op: tell XLA's scheduler there is no compute here.
        cost_estimate=pl.CostEstimate(
            flops=0, transcendentals=0, bytes_accessed=2 * total * itemsize),
    )(x2d)

    return out2d.reshape(orig_shape)


def la_block_forward(x: jax.Array, in_c: int = 4, basic_c: int = 128,
                     *, use_pallas_copy: bool = False) -> jax.Array:
    """LABlock.forward (identity).

    `in_c` / `basic_c` mirror the PyTorch __init__ signature; the module
    creates no parameters, so there is nothing to initialize or compute.

    Default (recommended) path returns `x` unchanged — zero HBM traffic and
    zero launch overhead.  Set `use_pallas_copy=True` only to exercise the
    Pallas identity-copy kernel for framework parity / testing.
    """
    if not use_pallas_copy or x.size == 0:
        return x
    return _pallas_identity_copy(x)


if __name__ == "__main__":
    key = jax.random.PRNGKey(0)
    # Small NCHW input consistent with the module's expected conv-style input.
    x = jax.random.normal(key, (2, 4, 16, 16), dtype=jnp.float32)

    # Production path: pure identity short-circuit (no kernel launched).
    y_fast = la_block_forward(x, in_c=4, basic_c=128)

    # Parity path: run the Pallas identity-copy kernel once.
    y = la_block_forward(x, in_c=4, basic_c=128, use_pallas_copy=True)
    y = jax.block_until_ready(y)

    # Forward is identity — verify exact equality on both paths.
    assert y.shape == x.shape and y.dtype == x.dtype
    assert y_fast.shape == x.shape and y_fast.dtype == x.dtype
    assert bool(jnp.all(y == x))
    assert bool(jnp.all(y_fast == x))
    print("KERNEL_OK")
</pallas_src>

<mosaic_0001>
module attributes {stable_mosaic.version = 11 : i64} {
  func.func @_identity_kernel(%arg0: i32, %arg1: memref<8x256xf32, #tpu.memory_space<vmem>>, %arg2: memref<8x256xf32, #tpu.memory_space<vmem>>) attributes {dimension_semantics = [#tpu.dimension_semantics<parallel>], iteration_bounds = array<i64: 1>, scalar_prefetch = 0 : i64, scratch_operands = 0 : i64, tpu.core_type = #tpu.core_type<tc>, window_params = [{transform_indices = @transform_0, window_bounds = array<i64: 8, 256>}, {transform_indices = @transform_1, window_bounds = array<i64: 8, 256>}]} {
    %c0 = arith.constant 0 : index
    %c0_0 = arith.constant 0 : index
    %0 = vector.load %arg1[%c0, %c0_0] : memref<8x256xf32, #tpu.memory_space<vmem>>, vector<8x256xf32>
    %c0_1 = arith.constant 0 : index
    %c0_2 = arith.constant 0 : index
    %1 = vector.load %arg2[%c0_1, %c0_2] : memref<8x256xf32, #tpu.memory_space<vmem>>, vector<8x256xf32>
    tpu.vector_store %arg2[%c0_1, %c0_2], %0 {strides = array<i32>} : memref<8x256xf32, #tpu.memory_space<vmem>>, vector<8x256xf32>,
    return
  }
  func.func @transform_0(%arg0: i32) -> (i32, i32) {
    %c0_i32 = arith.constant 0 : i32
    %c0_i32_0 = arith.constant 0 : i32
    return %arg0, %c0_i32 : i32, i32
  }
  func.func @transform_1(%arg0: i32) -> (i32, i32) {
    %c0_i32 = arith.constant 0 : i32
    %c0_i32_0 = arith.constant 0 : i32
    return %arg0, %c0_i32 : i32, i32
  }
}

</mosaic_0001>

<bundles_post_ra>
// kernel: tpu_custom_call.1
= control target key start
LH: loop header
LB: loop body
LE: loop exit
PB: predicated region body
PF: predicated region fallthrough
CT: control target
= control target key end

     0   :  { %6 = vsyncpa [#allocation3], 0  ;;  %s104_s0 = inlined_call_operand.hbm [shape: f32[8,256], index: 0, kind: input, shape index: {}]   ;;  %s105_s1 = inlined_call_operand.hbm [shape: f32[8,256], index: 1, kind: output, shape index: {}]  }
   0x1   :  { %7 = vsyncpa [#allocation4], 0  ;;  %s86_s6 = smov [#allocation2]  }
   0x2   :  { %s14_s7 = sshll.u32 %s86_s6, 4  ;;  %s15_s7 = int_to_ptr.vmem [resolvable:$true] %s14_s7 }
   0x3   :  { %s50_s8 = scalar_lea.vmem %s15_s7, 256  ;;  %p55_p1 = scmp.lt.s32.totalorder %s15_s7, %s15_s7 }
   0x4   :  { %p51_p0 = scmp.ne.s32.totalorder %s15_s7, %s50_s8  ;;  %p56_p2 = scmp.lt.s32.totalorder %s50_s8, %s50_s8 }
   0x6   :  { %p57_p3 = por %p56_p2, %p55_p1 }
   0x8   :  { %p58_p4 = pnand %p57_p3, %p51_p0 }
   0xa   :  { %61 = shalt.err (!%p58_p4)
}
   0xb   :  { %17 = dma.hbm_to_vmem [thread:$0]  %s104_s0, 256, %s15_s7, [#allocation3]  }
   0xc   :  { %82 = dma.done.wait [#allocation3], 256  }
   0xd   :  { %83 = vsyncadd [#allocation3], 4294967040  ;;  %s87_s11 = smov [#allocation5]   ;;  %v21_v0 = vld [vmem:[#allocation2] sm:$0xff]  ;;  %v22_v1 = vld [vmem:[#allocation2 + $0x8] sm:$0xff] }
   0xe   :  { %s31_s12 = sshll.u32 %s87_s11, 4  ;;  %23 = vst [vmem:[#allocation5] sm:$0xff] %v21_v0  ;;  %24 = vst [vmem:[#allocation5 + $0x8] sm:$0xff] %v22_v1  ;;  %s32_s12 = int_to_ptr.vmem [resolvable:$true] %s31_s12 }
   0xf   :  { %s62_s13 = scalar_lea.vmem %s32_s12, 256  ;;  %p67_p6 = scmp.lt.s32.totalorder %s32_s12, %s32_s12 }
  0x10   :  { %p63_p5 = scmp.ne.s32.totalorder %s32_s12, %s62_s13  ;;  %p68_p7 = scmp.lt.s32.totalorder %s62_s13, %s62_s13 }
  0x12   :  { %p69_p8 = por %p68_p7, %p67_p6 }
  0x14   :  { %p70_p9 = pnand %p69_p8, %p63_p5 }
  0x16   :  { %73 = shalt.err (!%p70_p9)
}
  0x17   :  { %34 = dma.vmem_to_hbm [thread:$0]  %s32_s12, 256, %s105_s1, [#allocation4]  }
  0x18   :  { %84 = dma.done.wait [#allocation4], 256  }
  0x19   :  { %85 = vsyncadd [#allocation4], 4294967040 }
  0x1a   :  { %38 = vsyncpa [#allocation3], 1 }
  0x1b   :  { %39 = vsyncpa [#allocation4], 1 }

</bundles_post_ra>
